<compile_context>
chip_gen: v6e
topology: v6e:2x2x1
jax: 0.10.0
libtpu: 0.0.40
codegen_flags: <defaults>
</compile_context>

<pallas_src>
import jax
import jax.numpy as jnp
from jax.experimental import pallas as pl
from jax.experimental.pallas import tpu as pltpu

HIDDEN = 8  # hidden width of the MLP (Linear(2, 8))


def mlp_kernel(params_ref, xT_ref, o_ref):
    # params_ref: SMEM f32[33] (scalar-prefetched)
    #   [0:8)   -> W1[:, 0]   (weight on input feature 0)
    #   [8:16)  -> W1[:, 1]   (weight on input feature 1)
    #   [16:24) -> b1
    #   [24:32) -> W2[0, :]
    #   [32]    -> b2
    # xT_ref: VMEM f32[2, tn//128, 128]  (batch rides sublane x lane: fully dense vregs)
    # o_ref : VMEM f32[tn//128, 128]
    x0 = xT_ref[0]  # (tn//128, 128)
    x1 = xT_ref[1]  # (tn//128, 128)

    acc = jnp.zeros_like(x0)
    # Fully unrolled over the 8 hidden units: pure VPU, MXU never touched.
    for j in range(HIDDEN):
        h = (x0 * params_ref[j]
             + x1 * params_ref[HIDDEN + j]
             + params_ref[2 * HIDDEN + j])
        h = jnp.maximum(h, 0.0)               # ReLU
        acc = acc + h * params_ref[3 * HIDDEN + j]
    o_ref[...] = (acc + params_ref[4 * HIDDEN]).astype(o_ref.dtype)


def _mlp_pallas(xT3, params, tn):
    """xT3: (2, S, 128) f32 with S % (tn//128) == 0;  params: (33,) f32."""
    S = xT3.shape[1]
    st = tn // 128                 # sublane-rows per tile (multiple of 8)
    num_blocks = S // st

    return pl.pallas_call(
        mlp_kernel,
        out_shape=jax.ShapeDtypeStruct((S, 128), jnp.float32),
        grid_spec=pltpu.PrefetchScalarGridSpec(
            num_scalar_prefetch=1,                      # params -> SMEM, once, before grid
            grid=(num_blocks,),
            in_specs=[pl.BlockSpec((2, st, 128), lambda i, p: (0, i, 0))],
            out_specs=pl.BlockSpec((st, 128), lambda i, p: (i, 0)),
        ),
        compiler_params=pltpu.CompilerParams(
            dimension_semantics=("parallel",),          # megacore sharding on v7x
            vmem_limit_bytes=32 * 1024 * 1024,          # safe ceiling on v5e/v6e/v7x
        ),
    )(params, xT3)


def my_neural_net(x, w1, b1, w2, b2, *, tn=262144, small_n_threshold=2048):
    """Forward pass of MyNeuralNet.

    x : (N, 2) float32
    w1: (8, 2), b1: (8,), w2: (1, 8), b2: (1,)   (PyTorch nn.Linear layout)
    returns (N, 1) float32
    """
    N = x.shape[0]
    x = x.astype(jnp.float32)
    w1 = w1.astype(jnp.float32)
    b1 = b1.astype(jnp.float32)
    w2 = w2.astype(jnp.float32)
    b2 = b2.astype(jnp.float32)

    # Pure-JAX fast path for tiny batches: pad/transpose/launch overhead dominates.
    if N < small_n_threshold:
        return jnp.maximum(x @ w1.T + b1, 0.0) @ w2.T + b2

    # Tile selection: tn must be a multiple of 1024 (so the (tn//128, 128) block
    # satisfies the (8,128) rule); keep >= 2 blocks when possible (v7x has 2 TCs).
    n_rounded = pl.cdiv(N, 1024) * 1024
    tn = min(tn, n_rounded)
    tn = max(1024, (tn // 1024) * 1024)
    if n_rounded >= 2 * 1024 and tn > n_rounded // 2:
        tn = max(1024, ((n_rounded // 2) // 1024) * 1024)
    n_pad = pl.cdiv(n_rounded, tn) * tn

    # Pack the 33 parameter scalars into one SMEM-prefetched vector.
    params = jnp.concatenate(
        [w1[:, 0], w1[:, 1], b1.reshape(-1), w2[0, :], b2.reshape(-1)]
    ).astype(jnp.float32)  # shape (33,)

    # Feature-major, sublane+lane-dense layout: (2, n_pad) -> (2, n_pad//128, 128).
    # The reshape is a free view on a contiguous array; the padded tail computes
    # relu(b1)*w2 + b2 and is sliced away below.
    xT = jnp.zeros((2, n_pad), dtype=jnp.float32).at[:, :N].set(x.T)
    xT3 = xT.reshape(2, n_pad // 128, 128)

    out = _mlp_pallas(xT3, params, tn)          # (n_pad//128, 128)
    return out.reshape(n_pad)[:N].reshape(N, 1)


def init_params(key):
    """Deterministic init mimicking PyTorch nn.Linear default (uniform(+/- 1/sqrt(fan_in)))."""
    k1, k2, k3, k4 = jax.random.split(key, 4)
    bound1 = 1.0 / jnp.sqrt(2.0)   # fan_in = 2
    bound2 = 1.0 / jnp.sqrt(8.0)   # fan_in = 8
    w1 = jax.random.uniform(k1, (8, 2), jnp.float32, -bound1, bound1)
    b1 = jax.random.uniform(k2, (8,), jnp.float32, -bound1, bound1)
    w2 = jax.random.uniform(k3, (1, 8), jnp.float32, -bound2, bound2)
    b2 = jax.random.uniform(k4, (1,), jnp.float32, -bound2, bound2)
    return w1, b1, w2, b2


def _reference(x, w1, b1, w2, b2):
    return jnp.maximum(x @ w1.T + b1, 0.0) @ w2.T + b2


if __name__ == "__main__":
    key = jax.random.PRNGKey(0)
    w1, b1, w2, b2 = init_params(key)

    # 1) The reference script's input: x = [[1,2],[3,4],[5,6],[7,8]] -> small-N fast path.
    x_small = jnp.array([[1.0, 2.0], [3.0, 4.0], [5.0, 6.0], [7.0, 8.0]], dtype=jnp.float32)
    out_small = jax.block_until_ready(my_neural_net(x_small, w1, b1, w2, b2))
    ref_small = _reference(x_small, w1, b1, w2, b2)
    assert out_small.shape == (4, 1), out_small.shape
    assert jnp.allclose(out_small, ref_small, atol=1e-5), (out_small, ref_small)

    # 2) A larger batch that exercises the Pallas kernel path (N >= 2048 -> kernel).
    xk = jax.random.split(key, 1)[0]
    x_large = jax.random.normal(xk, (4096, 2), jnp.float32)
    out_large = jax.block_until_ready(my_neural_net(x_large, w1, b1, w2, b2))
    ref_large = _reference(x_large, w1, b1, w2, b2)
    assert out_large.shape == (4096, 1), out_large.shape
    assert jnp.allclose(out_large, ref_large, atol=1e-5, rtol=1e-5)

    print("KERNEL_OK")
</pallas_src>

<mosaic_0001>
module attributes {stable_mosaic.version = 11 : i64} {
  func.func @mlp_kernel(%arg0: i32, %arg1: memref<33xf32, #tpu.memory_space<smem>>, %arg2: memref<2x16x128xf32, #tpu.memory_space<vmem>>, %arg3: memref<16x128xf32, #tpu.memory_space<vmem>>) attributes {dimension_semantics = [#tpu.dimension_semantics<parallel>], iteration_bounds = array<i64: 2>, scalar_prefetch = 1 : i64, scratch_operands = 0 : i64, tpu.core_type = #tpu.core_type<tc>, window_params = [{transform_indices = @transform_0, window_bounds = array<i64: 2, 16, 128>}, {transform_indices = @transform_1, window_bounds = array<i64: 16, 128>}]} {
    %c0 = arith.constant 0 : index
    %c0_0 = arith.constant 0 : index
    %c0_1 = arith.constant 0 : index
    %0 = vector.load %arg2[%c0, %c0_0, %c0_1] : memref<2x16x128xf32, #tpu.memory_space<vmem>>, vector<1x16x128xf32>
    %1 = vector.shape_cast %0 : vector<1x16x128xf32> to vector<16x128xf32>
    %c1 = arith.constant 1 : index
    %c0_2 = arith.constant 0 : index
    %c0_3 = arith.constant 0 : index
    %2 = vector.load %arg2[%c1, %c0_2, %c0_3] : memref<2x16x128xf32, #tpu.memory_space<vmem>>, vector<1x16x128xf32>
    %3 = vector.shape_cast %2 : vector<1x16x128xf32> to vector<16x128xf32>
    %cst = arith.constant 0.000000e+00 : f32
    %4 = vector.broadcast %cst : f32 to vector<16x128xf32>
    %c0_4 = arith.constant 0 : index
    %5 = memref.load %arg1[%c0_4] : memref<33xf32, #tpu.memory_space<smem>>
    %6 = vector.broadcast %5 : f32 to vector<16x128xf32>
    %7 = arith.mulf %1, %6 : vector<16x128xf32>
    %c8 = arith.constant 8 : index
    %8 = memref.load %arg1[%c8] : memref<33xf32, #tpu.memory_space<smem>>
    %9 = vector.broadcast %8 : f32 to vector<16x128xf32>
    %10 = arith.mulf %3, %9 : vector<16x128xf32>
    %11 = arith.addf %7, %10 : vector<16x128xf32>
    %c16 = arith.constant 16 : index
    %12 = memref.load %arg1[%c16] : memref<33xf32, #tpu.memory_space<smem>>
    %13 = vector.broadcast %12 : f32 to vector<16x128xf32>
    %14 = arith.addf %11, %13 : vector<16x128xf32>
    %cst_5 = arith.constant 0.000000e+00 : f32
    %15 = vector.broadcast %cst_5 : f32 to vector<16x128xf32>
    %16 = arith.maximumf %14, %15 : vector<16x128xf32>
    %c24 = arith.constant 24 : index
    %17 = memref.load %arg1[%c24] : memref<33xf32, #tpu.memory_space<smem>>
    %18 = vector.broadcast %17 : f32 to vector<16x128xf32>
    %19 = arith.mulf %16, %18 : vector<16x128xf32>
    %20 = arith.addf %4, %19 : vector<16x128xf32>
    %c1_6 = arith.constant 1 : index
    %21 = memref.load %arg1[%c1_6] : memref<33xf32, #tpu.memory_space<smem>>
    %22 = vector.broadcast %21 : f32 to vector<16x128xf32>
    %23 = arith.mulf %1, %22 : vector<16x128xf32>
    %c9 = arith.constant 9 : index
    %24 = memref.load %arg1[%c9] : memref<33xf32, #tpu.memory_space<smem>>
    %25 = vector.broadcast %24 : f32 to vector<16x128xf32>
    %26 = arith.mulf %3, %25 : vector<16x128xf32>
    %27 = arith.addf %23, %26 : vector<16x128xf32>
    %c17 = arith.constant 17 : index
    %28 = memref.load %arg1[%c17] : memref<33xf32, #tpu.memory_space<smem>>
    %29 = vector.broadcast %28 : f32 to vector<16x128xf32>
    %30 = arith.addf %27, %29 : vector<16x128xf32>
    %cst_7 = arith.constant 0.000000e+00 : f32
    %31 = vector.broadcast %cst_7 : f32 to vector<16x128xf32>
    %32 = arith.maximumf %30, %31 : vector<16x128xf32>
    %c25 = arith.constant 25 : index
    %33 = memref.load %arg1[%c25] : memref<33xf32, #tpu.memory_space<smem>>
    %34 = vector.broadcast %33 : f32 to vector<16x128xf32>
    %35 = arith.mulf %32, %34 : vector<16x128xf32>
    %36 = arith.addf %20, %35 : vector<16x128xf32>
    %c2 = arith.constant 2 : index
    %37 = memref.load %arg1[%c2] : memref<33xf32, #tpu.memory_space<smem>>
    %38 = vector.broadcast %37 : f32 to vector<16x128xf32>
    %39 = arith.mulf %1, %38 : vector<16x128xf32>
    %c10 = arith.constant 10 : index
    %40 = memref.load %arg1[%c10] : memref<33xf32, #tpu.memory_space<smem>>
    %41 = vector.broadcast %40 : f32 to vector<16x128xf32>
    %42 = arith.mulf %3, %41 : vector<16x128xf32>
    %43 = arith.addf %39, %42 : vector<16x128xf32>
    %c18 = arith.constant 18 : index
    %44 = memref.load %arg1[%c18] : memref<33xf32, #tpu.memory_space<smem>>
    %45 = vector.broadcast %44 : f32 to vector<16x128xf32>
    %46 = arith.addf %43, %45 : vector<16x128xf32>
    %cst_8 = arith.constant 0.000000e+00 : f32
    %47 = vector.broadcast %cst_8 : f32 to vector<16x128xf32>
    %48 = arith.maximumf %46, %47 : vector<16x128xf32>
    %c26 = arith.constant 26 : index
    %49 = memref.load %arg1[%c26] : memref<33xf32, #tpu.memory_space<smem>>
    %50 = vector.broadcast %49 : f32 to vector<16x128xf32>
    %51 = arith.mulf %48, %50 : vector<16x128xf32>
    %52 = arith.addf %36, %51 : vector<16x128xf32>
    %c3 = arith.constant 3 : index
    %53 = memref.load %arg1[%c3] : memref<33xf32, #tpu.memory_space<smem>>
    %54 = vector.broadcast %53 : f32 to vector<16x128xf32>
    %55 = arith.mulf %1, %54 : vector<16x128xf32>
    %c11 = arith.constant 11 : index
    %56 = memref.load %arg1[%c11] : memref<33xf32, #tpu.memory_space<smem>>
    %57 = vector.broadcast %56 : f32 to vector<16x128xf32>
    %58 = arith.mulf %3, %57 : vector<16x128xf32>
    %59 = arith.addf %55, %58 : vector<16x128xf32>
    %c19 = arith.constant 19 : index
    %60 = memref.load %arg1[%c19] : memref<33xf32, #tpu.memory_space<smem>>
    %61 = vector.broadcast %60 : f32 to vector<16x128xf32>
    %62 = arith.addf %59, %61 : vector<16x128xf32>
    %cst_9 = arith.constant 0.000000e+00 : f32
    %63 = vector.broadcast %cst_9 : f32 to vector<16x128xf32>
    %64 = arith.maximumf %62, %63 : vector<16x128xf32>
    %c27 = arith.constant 27 : index
    %65 = memref.load %arg1[%c27] : memref<33xf32, #tpu.memory_space<smem>>
    %66 = vector.broadcast %65 : f32 to vector<16x128xf32>
    %67 = arith.mulf %64, %66 : vector<16x128xf32>
    %68 = arith.addf %52, %67 : vector<16x128xf32>
    %c4 = arith.constant 4 : index
    %69 = memref.load %arg1[%c4] : memref<33xf32, #tpu.memory_space<smem>>
    %70 = vector.broadcast %69 : f32 to vector<16x128xf32>
    %71 = arith.mulf %1, %70 : vector<16x128xf32>
    %c12 = arith.constant 12 : index
    %72 = memref.load %arg1[%c12] : memref<33xf32, #tpu.memory_space<smem>>
    %73 = vector.broadcast %72 : f32 to vector<16x128xf32>
    %74 = arith.mulf %3, %73 : vector<16x128xf32>
    %75 = arith.addf %71, %74 : vector<16x128xf32>
    %c20 = arith.constant 20 : index
    %76 = memref.load %arg1[%c20] : memref<33xf32, #tpu.memory_space<smem>>
    %77 = vector.broadcast %76 : f32 to vector<16x128xf32>
    %78 = arith.addf %75, %77 : vector<16x128xf32>
    %cst_10 = arith.constant 0.000000e+00 : f32
    %79 = vector.broadcast %cst_10 : f32 to vector<16x128xf32>
    %80 = arith.maximumf %78, %79 : vector<16x128xf32>
    %c28 = arith.constant 28 : index
    %81 = memref.load %arg1[%c28] : memref<33xf32, #tpu.memory_space<smem>>
    %82 = vector.broadcast %81 : f32 to vector<16x128xf32>
    %83 = arith.mulf %80, %82 : vector<16x128xf32>
    %84 = arith.addf %68, %83 : vector<16x128xf32>
    %c5 = arith.constant 5 : index
    %85 = memref.load %arg1[%c5] : memref<33xf32, #tpu.memory_space<smem>>
    %86 = vector.broadcast %85 : f32 to vector<16x128xf32>
    %87 = arith.mulf %1, %86 : vector<16x128xf32>
    %c13 = arith.constant 13 : index
    %88 = memref.load %arg1[%c13] : memref<33xf32, #tpu.memory_space<smem>>
    %89 = vector.broadcast %88 : f32 to vector<16x128xf32>
    %90 = arith.mulf %3, %89 : vector<16x128xf32>
    %91 = arith.addf %87, %90 : vector<16x128xf32>
    %c21 = arith.constant 21 : index
    %92 = memref.load %arg1[%c21] : memref<33xf32, #tpu.memory_space<smem>>
    %93 = vector.broadcast %92 : f32 to vector<16x128xf32>
    %94 = arith.addf %91, %93 : vector<16x128xf32>
    %cst_11 = arith.constant 0.000000e+00 : f32
    %95 = vector.broadcast %cst_11 : f32 to vector<16x128xf32>
    %96 = arith.maximumf %94, %95 : vector<16x128xf32>
    %c29 = arith.constant 29 : index
    %97 = memref.load %arg1[%c29] : memref<33xf32, #tpu.memory_space<smem>>
    %98 = vector.broadcast %97 : f32 to vector<16x128xf32>
    %99 = arith.mulf %96, %98 : vector<16x128xf32>
    %100 = arith.addf %84, %99 : vector<16x128xf32>
    %c6 = arith.constant 6 : index
    %101 = memref.load %arg1[%c6] : memref<33xf32, #tpu.memory_space<smem>>
    %102 = vector.broadcast %101 : f32 to vector<16x128xf32>
    %103 = arith.mulf %1, %102 : vector<16x128xf32>
    %c14 = arith.constant 14 : index
    %104 = memref.load %arg1[%c14] : memref<33xf32, #tpu.memory_space<smem>>
    %105 = vector.broadcast %104 : f32 to vector<16x128xf32>
    %106 = arith.mulf %3, %105 : vector<16x128xf32>
    %107 = arith.addf %103, %106 : vector<16x128xf32>
    %c22 = arith.constant 22 : index
    %108 = memref.load %arg1[%c22] : memref<33xf32, #tpu.memory_space<smem>>
    %109 = vector.broadcast %108 : f32 to vector<16x128xf32>
    %110 = arith.addf %107, %109 : vector<16x128xf32>
    %cst_12 = arith.constant 0.000000e+00 : f32
    %111 = vector.broadcast %cst_12 : f32 to vector<16x128xf32>
    %112 = arith.maximumf %110, %111 : vector<16x128xf32>
    %c30 = arith.constant 30 : index
    %113 = memref.load %arg1[%c30] : memref<33xf32, #tpu.memory_space<smem>>
    %114 = vector.broadcast %113 : f32 to vector<16x128xf32>
    %115 = arith.mulf %112, %114 : vector<16x128xf32>
    %116 = arith.addf %100, %115 : vector<16x128xf32>
    %c7 = arith.constant 7 : index
    %117 = memref.load %arg1[%c7] : memref<33xf32, #tpu.memory_space<smem>>
    %118 = vector.broadcast %117 : f32 to vector<16x128xf32>
    %119 = arith.mulf %1, %118 : vector<16x128xf32>
    %c15 = arith.constant 15 : index
    %120 = memref.load %arg1[%c15] : memref<33xf32, #tpu.memory_space<smem>>
    %121 = vector.broadcast %120 : f32 to vector<16x128xf32>
    %122 = arith.mulf %3, %121 : vector<16x128xf32>
    %123 = arith.addf %119, %122 : vector<16x128xf32>
    %c23 = arith.constant 23 : index
    %124 = memref.load %arg1[%c23] : memref<33xf32, #tpu.memory_space<smem>>
    %125 = vector.broadcast %124 : f32 to vector<16x128xf32>
    %126 = arith.addf %123, %125 : vector<16x128xf32>
    %cst_13 = arith.constant 0.000000e+00 : f32
    %127 = vector.broadcast %cst_13 : f32 to vector<16x128xf32>
    %128 = arith.maximumf %126, %127 : vector<16x128xf32>
    %c31 = arith.constant 31 : index
    %129 = memref.load %arg1[%c31] : memref<33xf32, #tpu.memory_space<smem>>
    %130 = vector.broadcast %129 : f32 to vector<16x128xf32>
    %131 = arith.mulf %128, %130 : vector<16x128xf32>
    %132 = arith.addf %116, %131 : vector<16x128xf32>
    %c32 = arith.constant 32 : index
    %133 = memref.load %arg1[%c32] : memref<33xf32, #tpu.memory_space<smem>>
    %134 = vector.broadcast %133 : f32 to vector<16x128xf32>
    %135 = arith.addf %132, %134 : vector<16x128xf32>
    %c0_14 = arith.constant 0 : index
    %c0_15 = arith.constant 0 : index
    %136 = vector.load %arg3[%c0_14, %c0_15] : memref<16x128xf32, #tpu.memory_space<vmem>>, vector<16x128xf32>
    tpu.vector_store %arg3[%c0_14, %c0_15], %135 {strides = array<i32>} : memref<16x128xf32, #tpu.memory_space<vmem>>, vector<16x128xf32>,
    return
  }
  func.func @transform_0(%arg0: i32, %arg1: memref<33xf32, #tpu.memory_space<smem>>) -> (i32, i32, i32) {
    %c0_i32 = arith.constant 0 : i32
    %c0_i32_0 = arith.constant 0 : i32
    %c0_i32_1 = arith.constant 0 : i32
    return %c0_i32, %arg0, %c0_i32_0 : i32, i32, i32
  }
  func.func @transform_1(%arg0: i32, %arg1: memref<33xf32, #tpu.memory_space<smem>>) -> (i32, i32) {
    %c0_i32 = arith.constant 0 : i32
    %c0_i32_0 = arith.constant 0 : i32
    return %arg0, %c0_i32 : i32, i32
  }
}

</mosaic_0001>

<bundles_post_ra>
// kernel: tpu_custom_call.1
= control target key start
LH: loop header
LB: loop body
LE: loop exit
PB: predicated region body
PF: predicated region fallthrough
CT: control target
= control target key end

     0   :  { %s626_s9 = smov [#allocation3]   ;;  %s916_s0 = inlined_call_operand.hbm [shape: f32[33], index: 0, kind: input, shape index: {}]   ;;  %s917_s1 = inlined_call_operand.hbm [shape: f32[2,32,128], index: 1, kind: input, shape index: {}]   ;;  %s918_s2 = inlined_call_operand.hbm [shape: f32[32,128], index: 2, kind: output, shape index: {}]  }
   0x1   :  { %8 = dma.hbm_to_smem %s916_s0, 16, %s626_s9, [#allocation2] }
   0x2   :  { %600 = dma.done.wait [#allocation2], 16 }
   0x3   :  { %601 = vsyncadd [#allocation2], 4294967280 }
   0x4   :  { %10 = sfence }
   0x5   :  { %11 = vsyncpa [#allocation5], 0 }
   0x6   :  { %13 = vsyncpa [#allocation5 + $0x1], 0 }
   0x7   :  { %14 = vsyncpa [#allocation6], 0 }
   0x8   :  { %16 = vsyncpa [#allocation6 + $0x1], 0  ;;  %s654_s12 = smov 0   ;;  %s656_s13 = smov 0  }
   0x9   :  { %s658_s14 = smov 0   ;;  %s660_s15 = smov 0  }
   0xa LB: > { %s675_s0 = sadd.s32 4294967295, %s624_s15   ;;  %s441_s16 = sadd.s32 4294967294, %s624_s15   ;;  %s624_s15 = sphi %s660_s15, %s926_s15   ;;  %s620_s14 = sphi %s658_s14, %s925_s14   ;;  %s616_s13 = sphi %s656_s13, %s924_s13   ;;  %s612_s12 = sphi %s654_s12, %s923_s12  }
   0xb   : > { %s679_s17 = sadd.s32 1, %s624_s15   ;;  %s29_s18 = sadd.s32 1, %s620_s14 }
   0xc   : > { %s26_s19 = ssub.s32 %s624_s15, %s679_s17  ;;  %p36_p0 = scmp.ne.s32.totalorder %s620_s14, %s616_s13 }
   0xd   : > { %p27_p1 = scmp.eq.s32.totalorder %s26_s19, 0  ;;  %p37_p2 = scmp.eq.s32.totalorder %s624_s15, 0 }
   0xe   : > { %p42_p3 = scmp.ne.s32.totalorder %s616_s13, %s612_s12  ;;  %p43_p4 = scmp.eq.s32.totalorder %s675_s0, 0 }
   0xf   : > { %s691_s20 = scalar_select %p27_p1, %s620_s14, %s29_s18  }
  0x10   : > { %p693_p5 = por %p37_p2, %p36_p0  ;;  %p697_p6 = por %p43_p4, %p42_p3 }
  0x11   : > { %p66_p7 = scmp.eq.s32.totalorder %s675_s0, 1  ;;  %p72_p8 = scmp.eq.s32.totalorder %s441_s16, 1 }
  0x12   : > { %p443_p11 = scmp.ge.s32.totalorder %s624_s15, 2 }
  0x13   : > { %p702_p9 = por %p66_p7, %p36_p0  ;;  %p706_p10 = por %p72_p8, %p42_p3 }
  0x14   : > { %88 = sbr.rel (%p443_p11) target bundleno = 38 (0x26), region = 16 }
  0x19   : > { %s92_s25 = sand.u32 1, %s620_s14   ;;  %s491_s26 = sshll.u32 %s624_s15, 8 }
  0x1a   : > { %s444_s27 = sshll.u32 %s92_s25, 5  ;;  %s102_s30 = scalar_lea.hbm %s917_s1, %s491_s26 }
  0x1b   : > { %s493_s3 = scalar_select %p693_p5, [#allocation0], [#allocation10] }
  0x1c   : > { %s96_s4 = scalar_lea.vmem [#allocation4], %s444_s27  ;;  %s627_s7 = smov 512  }
  0x1d   : > { %s115_s5 = sshll.u32 %s96_s4, 4  ;;  %s107_s6 = sld [smem:[%s493_s3]]   ;;  %s116_s5 = int_to_ptr.vmem [resolvable:$true] %s115_s5 }
  0x1e   : > { %494 = sst [smem:[#allocation9]] (%p693_p5), %s627_s7  ;;  %s628_s8 = smov 256  }
  0x1f   : > { %495 = sst [smem:[#allocation9 + $0x1]] (%p693_p5), %s628_s8  ;;  %s629_s9 = smov 2  }
  0x20   : > { %496 = sst [smem:[#allocation9 + $0x2]] (%p693_p5), %s629_s9  ;;  %s630_s10 = smov 128  }
  0x21   : > { %497 = sst [smem:[#allocation9 + $0x3]] (%p693_p5), %s630_s10  ;;  %s631_s16 = smov 8  }
  0x22   : > { %498 = sst [smem:[#allocation9 + $0x4]] (%p693_p5), %s630_s10  ;;  %s93_s19 = scalar_lea.sflag [#allocation5], %s92_s25 }
  0x23   : > { %s447_s11 = sshll.u32 %s107_s6, 26  ;;  %499 = sst [smem:[#allocation9 + $0x5]] (%p693_p5), %s631_s16 }
  0x24   : > { %s448_s18 = sadd.s32 134217728, %s447_s11  ;;  %s632_s26 = smov 131072  }
  0x25   : > { %500 = dma.general (%p693_p5), %s102_s30, 512, %s116_s5, %s93_s19, %s632_s26, [#allocation9], %s448_s18, 0  }
  0x26 PF: > { %p449_p12 = scmp.ge.s32.totalorder %s624_s15, 1  ;;  %p136_p13 = scmp.lt.s32.totalorder %s624_s15, 3 }
  0x28   : > { %p137_p0 = pnand %p449_p12, %p136_p13 }
  0x29   : > { %s737_s27 = sand.u32 (!%p137_p0), 1, %s616_s13  }
  0x2a   : > { %140 = sbr.rel (%p137_p0) target bundleno = 116 (0x74), region = 24  ;;  %s450_s28 = sshll.u32 (!%p137_p0), %s737_s27, 5 }
  0x2b   : > { %s143_s29 = scalar_lea.sflag (!%p137_p0), [#allocation5], %s737_s27  ;;  %s146_s3 = scalar_lea.vmem (!%p137_p0), [#allocation4], %s450_s28 }
  0x2f   : > { %603 = dma.done.wait (%p697_p6), %s143_s29, 512  }
  0x30   : > { %605 = vsyncadd (%p697_p6), %s143_s29, 4294966784  ;;  %s172_s21 = sld [smem:[#allocation3]]  ;;  %v747_v0 = vld [vmem:[%s146_s3] sm:$0xff]  ;;  %v749_v1 = vld [vmem:[%s146_s3 + $0x10] sm:$0xff] }
  0x31   : > { %s454_s25 = sld [smem:[#allocation3 + $0x8]]  ;;  %v753_v3 = vld [vmem:[%s146_s3 + $0x8] sm:$0xff]  ;;  %v758_v6 = vld [vmem:[%s146_s3 + $0x18] sm:$0xff] }
  0x32   : > { %s455_s30 = sld [smem:[#allocation3 + $0x10]] }
  0x33   : > { %s745_s4 = sld [smem:[#allocation3 + $0x18]] }
  0x34   : > { %s457_s5 = sld [smem:[#allocation3 + $0x1]] }
  0x35   : > { %s458_s6 = sld [smem:[#allocation3 + $0x9]] }
  0x36   : > { %v173_v2 = vstv %s172_s21  ;;  %s751_s7 = sld [smem:[#allocation3 + $0x11]] }
  0x37   : > { %v174_v4 = vmul.f32 %v173_v2, %v747_v0  ;;  %v177_v5 = vstv %s454_s25  ;;  %s756_s22 = sld [smem:[#allocation3 + $0x19]]  ;;  %v175_v7 = vmul.f32 %v173_v2, %v753_v3 }
  0x38   : > { %v178_v8 = vmul.f32 %v749_v1, %v177_v5  ;;  %s461_s8 = sld [smem:[#allocation3 + $0x2]]  ;;  %v179_v9 = vmul.f32 %v758_v6, %v177_v5  ;;  %v183_v10 = vstv %s455_s30 }
  0x39   : > { %s763_s9 = sld [smem:[#allocation3 + $0xa]]  ;;  %v189_v23 = vstv %s745_s4 }
  0x3a   : > { %v180_v11 = vadd.f32 %v178_v8, %v174_v4  ;;  %v195_v12 = vstv %s457_s5  ;;  %s765_s10 = sld [smem:[#allocation3 + $0x12]]  ;;  %v181_v13 = vadd.f32 %v179_v9, %v175_v7 }
  0x3b   : > { %v196_v14 = vmul.f32 %v195_v12, %v747_v0  ;;  %v199_v15 = vstv %s458_s6  ;;  %s768_s11 = sld [smem:[#allocation3 + $0x1a]]  ;;  %v197_v16 = vmul.f32 %v195_v12, %v753_v3 }
  0x3c   : > { %v184_v17 = vadd.f32 %v183_v10, %v180_v11  ;;  %v200_v18 = vmul.f32 %v749_v1, %v199_v15  ;;  %s772_s16 = sld [smem:[#allocation3 + $0x3]]  ;;  %v185_v19 = vadd.f32 %v183_v10, %v181_v13  ;;  %v205_v20 = vstv %s751_s7 }
  0x3d   : > { %s775_s18 = sld [smem:[#allocation3 + $0xb]]  ;;  %v201_v21 = vmul.f32 %v758_v6, %v199_v15  ;;  %v211_v31 = vstv %s756_s22 }
  0x3e   : > { %v186_v22 = vmax.f32 %v184_v17, 0.0  ;;  %v202_v24 = vadd.f32 %v200_v18, %v196_v14  ;;  %v217_v25 = vstv %s461_s8  ;;  %s779_s19 = sld [smem:[#allocation3 + $0x13]]  ;;  %v187_v33 = vmax.f32 %v185_v19, 0.0 }
  0x3f   : > { %v218_v26 = vmul.f32 %v217_v25, %v747_v0  ;;  %v221_v27 = vstv %s763_s9  ;;  %s783_s26 = sld [smem:[#allocation3 + $0x1b]]  ;;  %v203_v28 = vadd.f32 %v201_v21, %v197_v16  ;;  %v219_v29 = vmul.f32 %v217_v25, %v753_v3 }
  0x40   : > { %v206_v30 = vadd.f32 %v205_v20, %v202_v24  ;;  %v222_v32 = vmul.f32 %v749_v1, %v221_v27  ;;  %s788_s28 = sld [smem:[#allocation3 + $0x4]]  ;;  %v190_v34 = vmul.f32 %v189_v23, %v186_v22  ;;  %v227_v35 = vstv %s765_s10 }
  0x41   : > { %s791_s29 = sld [smem:[#allocation3 + $0xc]]  ;;  %v207_v36 = vadd.f32 %v205_v20, %v203_v28  ;;  %v223_v37 = vmul.f32 %v758_v6, %v221_v27  ;;  %v233_v40 = vstv %s768_s11  ;;  %v191_v49 = vmul.f32 %v189_v23, %v187_v33 }
  0x42   : > { %v208_v38 = vmax.f32 %v206_v30, 0.0  ;;  %v224_v39 = vadd.f32 %v222_v32, %v218_v26  ;;  %v239_v41 = vstv %s772_s16  ;;  %s796_s3 = sld [smem:[#allocation3 + $0x14]] }
  0x43   : > { %v240_v42 = vmul.f32 %v239_v41, %v747_v0  ;;  %v243_v43 = vstv %s775_s18  ;;  %s800_s21 = sld [smem:[#allocation3 + $0x1c]]  ;;  %v209_v44 = vmax.f32 %v207_v36, 0.0  ;;  %v225_v45 = vadd.f32 %v223_v37, %v219_v29 }
  0x44   : > { %v212_v46 = vmul.f32 %v211_v31, %v208_v38  ;;  %v228_v47 = vadd.f32 %v227_v35, %v224_v39  ;;  %v244_v48 = vmul.f32 %v749_v1, %v243_v43  ;;  %s803_s25 = sld [smem:[#allocation3 + $0x5]]  ;;  %v249_v50 = vstv %s779_s19  ;;  %s451_s19 = sshll.u32 %s737_s27, 4 }
  0x45   : > { %v255_v51 = vstv %s783_s26  ;;  %s807_s30 = sld [smem:[#allocation3 + $0xd]]  ;;  %v213_v52 = vmul.f32 %v211_v31, %v209_v44  ;;  %v229_v53 = vadd.f32 %v227_v35, %v225_v45  ;;  %v241_v61 = vmul.f32 %v239_v41, %v753_v3  ;;  %s164_s26 = scalar_lea.vmem [#allocation7], %s451_s19 }
  0x46   : > { %v214_v54 = vadd.f32 %v212_v46, %v190_v34  ;;  %v230_v55 = vmax.f32 %v228_v47, 0.0  ;;  %v246_v56 = vadd.f32 %v244_v48, %v240_v42  ;;  %v261_v57 = vstv %s788_s28  ;;  %s810_s4 = sld [smem:[#allocation3 + $0x15]]  ;;  %s368_s28 = sshll.u32 %s164_s26, 4  ;;  %s868_s28 = int_to_ptr.vmem [resolvable:$true] %s368_s28 }
  0x47   : > { %v262_v58 = vmul.f32 %v261_v57, %v747_v0  ;;  %v265_v59 = vstv %s791_s29  ;;  %s814_s5 = sld [smem:[#allocation3 + $0x1d]]  ;;  %v231_v60 = vmax.f32 %v229_v53, 0.0  ;;  %v215_v4 = vadd.f32 %v213_v52, %v191_v49  ;;  %s492_s29 = sshll.u32 %s675_s0, 8 }
  0x48   : > { %v234_v62 = vmul.f32 %v233_v40, %v230_v55  ;;  %v250_v63 = vadd.f32 %v249_v50, %v246_v56  ;;  %v266_v2 = vmul.f32 %v749_v1, %v265_v59  ;;  %s818_s6 = sld [smem:[#allocation3 + $0x6]]  ;;  %v271_v5 = vstv %s796_s3  ;;  %s633_s0 = smov [#allocation7]  }
  0x49   : > { %v277_v7 = vstv %s800_s21  ;;  %s822_s7 = sld [smem:[#allocation3 + $0xe]]  ;;  %v235_v8 = vmul.f32 %v233_v40, %v231_v60  ;;  %v245_v9 = vmul.f32 %v758_v6, %v243_v43  ;;  %v263_v17 = vmul.f32 %v261_v57, %v753_v3 }
  0x4a   : > { %v236_v10 = vadd.f32 %v234_v62, %v214_v54  ;;  %v252_v11 = vmax.f32 %v250_v63, 0.0  ;;  %v268_v12 = vadd.f32 %v266_v2, %v262_v58  ;;  %v283_v13 = vstv %s803_s25  ;;  %s826_s22 = sld [smem:[#allocation3 + $0x16]]  ;;  %s873_s25 = scalar_lea.hbm %s918_s2, %s492_s29 }
  0x4b   : > { %v284_v14 = vmul.f32 %v283_v13, %v747_v0  ;;  %v287_v15 = vstv %s807_s30  ;;  %s830_s8 = sld [smem:[#allocation3 + $0x1e]]  ;;  %v247_v16 = vadd.f32 %v245_v9, %v241_v61  ;;  %v237_v21 = vadd.f32 %v235_v8, %v215_v4  ;;  %s355_s30 = scalar_lea.sflag [#allocation6], %s737_s27 }
  0x4c   : > { %v256_v18 = vmul.f32 %v255_v51, %v252_v11  ;;  %v272_v19 = vadd.f32 %v271_v5, %v268_v12  ;;  %v288_v20 = vmul.f32 %v749_v1, %v287_v15  ;;  %s834_s9 = sld [smem:[#allocation3 + $0x7]]  ;;  %v293_v22 = vstv %s810_s4  ;;  %s558_s4 = scalar_lea.vmem %s868_s28, 256 }
  0x4d   : > { %v299_v23 = vstv %s814_s5  ;;  %s838_s10 = sld [smem:[#allocation3 + $0xf]]  ;;  %v251_v24 = vadd.f32 %v249_v50, %v247_v16  ;;  %v267_v25 = vmul.f32 %v758_v6, %v265_v59  ;;  %v285_v37 = vmul.f32 %v283_v13, %v753_v3  ;;  %p559_p1 = scmp.ne.s32.totalorder %s868_s28, %s558_s4 }
  0x4e   : > { %v258_v26 = vadd.f32 %v256_v18, %v236_v10  ;;  %v274_v27 = vmax.f32 %v272_v19, 0.0  ;;  %v290_v28 = vadd.f32 %v288_v20, %v284_v14  ;;  %v305_v29 = vstv %s818_s6  ;;  %s842_s11 = sld [smem:[#allocation3 + $0x17]]  ;;  %s562_s5 = sshll.u32 %s633_s0, 4  ;;  %s563_s5 = int_to_ptr.vmem [resolvable:$false] %s562_s5 }
  0x4f   : > { %v306_v30 = vmul.f32 %v305_v29, %v747_v0  ;;  %v309_v31 = vstv %s822_s7  ;;  %v253_v32 = vmax.f32 %v251_v24, 0.0  ;;  %v269_v33 = vadd.f32 %v267_v25, %v263_v17  ;;  %s849_s16 = sld [smem:[#allocation3 + $0x1f]]  ;;  %p560_p2 = pnand %p559_p1, %p702_p9 }
  0x50   : > { %v278_v34 = vmul.f32 %v277_v7, %v274_v27  ;;  %v294_v35 = vadd.f32 %v293_v22, %v290_v28  ;;  %v310_v36 = vmul.f32 %v749_v1, %v309_v31  ;;  %v315_v38 = vstv %s826_s22  ;;  %s858_s18 = sld [smem:[#allocation3 + $0x20]]  ;;  %s564_s6 = scalar_lea.vmem %s563_s5, 512 }
  0x51   : > { %v257_v39 = vmul.f32 %v255_v51, %v253_v32  ;;  %v273_v40 = vadd.f32 %v271_v5, %v269_v33  ;;  %v289_v41 = vmul.f32 %v758_v6, %v287_v15  ;;  %v321_v46 = vstv %s830_s8  ;;  %p561_p3 = pneg %p560_p2  ;;  %p565_p4 = scmp.lt.s32.totalorder %s868_s28, %s563_s5 }
  0x52   : > { %v280_v42 = vadd.f32 %v278_v34, %v258_v26  ;;  %v296_v43 = vmax.f32 %v294_v35, 0.0  ;;  %v312_v44 = vadd.f32 %v310_v36, %v306_v30  ;;  %v327_v45 = vstv %s834_s9  ;;  %p566_p5 = scmp.lt.s32.totalorder %s564_s6, %s558_s4 }
  0x53   : > { %v328_v47 = vmul.f32 %v327_v45, %v747_v0  ;;  %v331_v48 = vstv %s838_s10  ;;  %v275_v49 = vmax.f32 %v273_v40, 0.0  ;;  %v259_v54 = vadd.f32 %v257_v39, %v237_v21 }
  0x54   : > { %v300_v50 = vmul.f32 %v299_v23, %v296_v43  ;;  %v316_v52 = vadd.f32 %v315_v38, %v312_v44  ;;  %v332_v53 = vmul.f32 %v749_v1, %v331_v48  ;;  %v337_v55 = vstv %s842_s11  ;;  %p567_p6 = por %p566_p5, %p565_p4 }
  0x55   : > { %v279_v51 = vmul.f32 %v277_v7, %v275_v49  ;;  %v291_v56 = vadd.f32 %v289_v41, %v285_v37  ;;  %v307_v57 = vmul.f32 %v305_v29, %v753_v3  ;;  %v311_v61 = vmul.f32 %v758_v6, %v309_v31 }
  0x56   : > { %v302_v58 = vadd.f32 %v300_v50, %v280_v42  ;;  %v318_v59 = vmax.f32 %v316_v52, 0.0  ;;  %v334_v60 = vadd.f32 %v332_v53, %v328_v47  ;;  %v329_v62 = vmul.f32 %v327_v45, %v753_v3  ;;  %p568_p7 = pnand %p567_p6, %p561_p3 }
  0x57   : > { %v295_v0 = vadd.f32 %v293_v22, %v291_v56  ;;  %v333_v2 = vmul.f32 %v758_v6, %v331_v48  ;;  %v343_v4 = vstv %s849_s16  ;;  %v281_v5 = vadd.f32 %v279_v51, %v259_v54 }
  0x58   : > { %v322_v1 = vmul.f32 %v321_v46, %v318_v59  ;;  %v338_v63 = vadd.f32 %v337_v55, %v334_v60  ;;  %v313_v8 = vadd.f32 %v311_v61, %v307_v57  ;;  %v349_v16 = vstv %s858_s18 }
  0x59   : > { %v297_v7 = vmax.f32 %v295_v0, 0.0  ;;  %v335_v11 = vadd.f32 %v333_v2, %v329_v62 }
  0x5a   : > { %v324_v9 = vadd.f32 %v322_v1, %v302_v58  ;;  %v340_v10 = vmax.f32 %v338_v63, 0.0  ;;  %v317_v13 = vadd.f32 %v315_v38, %v313_v8 }
  0x5b   : > { %v301_v12 = vmul.f32 %v299_v23, %v297_v7  ;;  %v339_v15 = vadd.f32 %v337_v55, %v335_v11 }
  0x5c   : > { %v344_v14 = vmul.f32 %v343_v4, %v340_v10  ;;  %v319_v17 = vmax.f32 %v317_v13, 0.0 }
  0x5d   : > { %v303_v3 = vadd.f32 %v301_v12, %v281_v5  ;;  %v341_v19 = vmax.f32 %v339_v15, 0.0 }
  0x5e   : > { %v346_v18 = vadd.f32 %v344_v14, %v324_v9  ;;  %v323_v6 = vmul.f32 %v321_v46, %v319_v17 }
  0x5f   : > { %v345_v21 = vmul.f32 %v343_v4, %v341_v19 }
  0x60   : > { %v350_v20 = vadd.f32 %v349_v16, %v346_v18  ;;  %v325_v22 = vadd.f32 %v323_v6, %v303_v3 }
  0x62   : > { %352 = vst [vmem:[%s164_s26] sm:$0xff] %v350_v20  ;;  %v347_v24 = vadd.f32 %v345_v21, %v325_v22 }
  0x64   : > { %v351_v23 = vadd.f32 %v349_v16, %v347_v24 }
  0x66   : > { %353 = vst [vmem:[%s164_s26 + $0x8] sm:$0xff] %v351_v23 }
  0x67   : > { %571 = shalt.err (!%p568_p7)
}
  0x68   : > { %s572_s7 = scalar_lea.hbm %s873_s25, 256  ;;  %s576_s9 = scalar_lea.hbm %s918_s2, 512 }
  0x69   : > { %p573_p8 = scmp.ne.s32.totalorder %s873_s25, %s572_s7  ;;  %p577_p0 = scmp.lt.s32.totalorder %s873_s25, %s918_s2 }
  0x6a   : > { %p578_p1 = scmp.lt.s32.totalorder %s576_s9, %s572_s7 }
  0x6b   : > { %p574_p12 = pnand %p573_p8, %p702_p9 }
  0x6c   : > { %p579_p2 = por %p578_p1, %p577_p0 }
  0x6d   : > { %p575_p13 = pneg %p574_p12 }
  0x6f   : > { %p580_p3 = pnand %p579_p2, %p575_p13 }
  0x71   : > { %583 = shalt.err (!%p580_p3)
}
  0x72   : > { %s634_s16 = smov 128   ;;  %s635_s18 = smov 8  }
  0x73   : > { %502 = dma.vmem_to_hbm [thread:$0]  (%p702_p9), %s868_s28, 256, %s873_s25, %s355_s30, %s634_s16, %s634_s16, %s635_s18  }
  0x74 PF: > { %s383_s19 = sand.u32 1, %s612_s12   ;;  %p505_p4 = pnand %p443_p11, %p706_p10 }
  0x75   : > { %s384_s26 = scalar_lea.sflag [#allocation6], %s383_s19 }
  0x76   : > { %p506_p5 = pneg %p505_p4 }
  0x78   : > { %607 = dma.done.wait (%p506_p5), %s384_s26, 256  }
  0x79   : > { %609 = vsyncadd (%p506_p5), %s384_s26, 4294967040  ;;  %p19_p6 = scmp.ge.s32.totalorder %s679_s17, 4   ;;  %s923_s12 = smov %s616_s13 }
  0x7a   : > { %s924_s13 = smov %s620_s14  ;;  %s925_s14 = smov %s691_s20 }
  0x7b   : > { %s926_s15 = smov %s679_s17  ;;  %21 = sbr.rel (!%p19_p6) target bundleno = 10 (0xa), region = 75 }
  0x80   :  { %389 = vsyncpa [#allocation5], 1 }
  0x81   :  { %391 = vsyncpa [#allocation5 + $0x1], 1 }
  0x82   :  { %392 = vsyncpa [#allocation6], 1 }
  0x83   :  { %394 = vsyncpa [#allocation6 + $0x1], 1 }

</bundles_post_ra>
